<compile_context>
chip_gen: v5e
topology: v5e:2x2
jax: 0.10.0
libtpu: 0.0.40
codegen_flags: <defaults>
</compile_context>

<pallas_src>
import math

import jax
import jax.numpy as jnp
from jax.experimental import pallas as pl
from jax.experimental.pallas import tpu as pltpu


_SQRT1_2 = 1.0 / math.sqrt(2.0)


def _gelu_exact(x):
    # x * 0.5 * (1 + erf(x / sqrt(2)))  -- matches the PyTorch reference gelu.
    # TODO(synk): if bundle dumps show VALU saturating before MXU with resident
    # weights, switch to the tanh-approx gelu so the transcendental uses the EUP.
    return x * 0.5 * (1.0 + jax.lax.erf(x * _SQRT1_2))


def _round_up(n, m):
    return ((n + m - 1) // m) * m


def _vmem_capacity_bytes():
    try:
        return int(pltpu.get_tpu_info().vmem_capacity_bytes)
    except Exception:
        return 64 * 1024 * 1024  # conservative: v7x per-TensorCore capacity


def _pick_inter_tile(Ip, target):
    """Largest multiple of 128 <= target that exactly divides Ip (Ip % 128 == 0)."""
    cap = min(_round_up(target, 128), Ip)
    for ti in range(cap, 0, -128):
        if Ip % ti == 0:
            return ti
    return Ip


def _const_spec(block_shape):
    """BlockSpec for a block that is constant across the whole grid (resident).

    Buffered(1) avoids allocating a second pipeline buffer for a block that is
    never re-fetched; fall back to the default spec if the running jax version
    does not accept pipeline_mode.
    """
    index_map = lambda *_: (0,) * len(block_shape)
    try:
        return pl.BlockSpec(block_shape, index_map, pipeline_mode=pl.Buffered(1))
    except (TypeError, AttributeError):
        return pl.BlockSpec(block_shape, index_map)


def _ffn_resident_kernel(x_ref, w1_ref, b1_ref, w2_ref, b2_ref, o_ref):
    """Both linears fused; W1/W2/b1/b2 are VMEM-resident across the token grid."""
    h = jnp.dot(x_ref[...], w1_ref[...], preferred_element_type=jnp.float32)
    h = _gelu_exact(h + b1_ref[...])
    # NOTE: h is downcast to the compute dtype (e.g. bf16) before the second
    # matmul when compute_dtype=bf16; tiny divergence vs a pure-f32 PyTorch run.
    out = jnp.dot(h.astype(w2_ref.dtype), w2_ref[...],
                  preferred_element_type=jnp.float32)
    o_ref[...] = (out + b2_ref[...]).astype(o_ref.dtype)


def _ffn_streaming_kernel(x_ref, w1_ref, b1_ref, w2_ref, b2_ref, o_ref, acc_ref):
    """Fallback for weights too large to keep resident: stream intermediate chunks."""
    j = pl.program_id(1)  # intermediate-chunk (reduction) axis, last in grid

    @pl.when(j == 0)
    def _():
        acc_ref[...] = jnp.zeros_like(acc_ref)

    h = jnp.dot(x_ref[...], w1_ref[...], preferred_element_type=jnp.float32)
    h = _gelu_exact(h + b1_ref[...])  # elementwise in I => exact per chunk
    acc_ref[...] += jnp.dot(h.astype(w2_ref.dtype), w2_ref[...],
                            preferred_element_type=jnp.float32)

    @pl.when(j == pl.num_programs(1) - 1)
    def _():
        o_ref[...] = (acc_ref[...] + b2_ref[...]).astype(o_ref.dtype)


def make_position_wise_ffn(w1, b1, w2, b2, *, compute_dtype=None,
                           token_tile=None, inter_tile=2048, out_dtype=None):
    """Build an `apply(x)` callable with weights padded/cast once at init.

    w1: (hidden, intermediate) -- nn.Linear(hidden, intermediate) weight transposed
        so the kernel computes x @ w1.
    b1: (intermediate,), w2: (intermediate, hidden), b2: (hidden,).
    compute_dtype: matmul operand dtype (jnp.bfloat16 recommended on TPU; f32
        accumulation via preferred_element_type is always used). Defaults to
        w1.dtype.
    """
    H, I = w1.shape
    assert w2.shape == (I, H) and b1.shape == (I,) and b2.shape == (H,)

    cdt = jnp.dtype(w1.dtype if compute_dtype is None else compute_dtype)
    itemsize = cdt.itemsize

    # Lane-dense padding of the feature axes (multiples of 128). Zero padding
    # contributes exactly zero to the valid outputs.
    Hp = _round_up(H, 128)
    Ip = _round_up(I, 128)

    # Pad/cast the parameters ONCE (hoisted out of the per-call path).
    w1p = jnp.pad(w1.astype(cdt), ((0, Hp - H), (0, Ip - I)))
    w2p = jnp.pad(w2.astype(cdt), ((0, Ip - I), (0, Hp - H)))
    b1p = jnp.pad(b1.astype(jnp.float32), (0, Ip - I)).reshape(1, Ip)
    b2p = jnp.pad(b2.astype(jnp.float32), (0, Hp - H)).reshape(1, Hp)

    # Generation-gated VMEM budget: leave headroom for compiler scratch/spill.
    cap = _vmem_capacity_bytes()
    vmem_limit = max(32 << 20, min(cap - (16 << 20), 100 << 20))

    if token_tile is None:
        token_tile = 512 if cap <= (64 << 20) else 768  # v7x vs v5e/v6e
    token_tile = max(8, _round_up(token_tile, 8))

    weight_bytes = (w1p.size + w2p.size) * itemsize
    bias_bytes = (b1p.size + b2p.size) * 4

    # Conservative resident-layout budget (assumes 2 buffers per operand even
    # though constant blocks are fetched once / Buffered(1) keeps one buffer):
    # 2x weights + 2x x-tile + 2x out-tile + f32 intermediate h + slack.
    resident_bytes = (2 * weight_bytes
                      + 2 * token_tile * Hp * (itemsize + 4)
                      + token_tile * Ip * 4
                      + (4 << 20))
    resident = resident_bytes <= vmem_limit

    # Streaming fallback tiling: ti divides Ip exactly (no zero-chunk waste).
    ti = _pick_inter_tile(Ip, inter_tile)

    def apply(x):
        B, S, Hx = x.shape
        assert Hx == H
        out_dt = jnp.dtype(x.dtype if out_dtype is None else out_dtype)

        T = B * S
        # Keep >= 2 token tiles whenever possible so the "parallel" axis shards
        # across both TensorCores on v7x; clamp for tiny inputs.
        tm = max(8, min(token_tile, _round_up(pl.cdiv(T, 2), 8)))
        Tp = _round_up(T, tm)
        grid_i = Tp // tm

        x2 = jnp.pad(x.reshape(T, H).astype(cdt), ((0, Tp - T), (0, Hp - H)))

        io_bytes = Tp * Hp * (itemsize + out_dt.itemsize)
        flops = 4 * Tp * Hp * Ip          # two (Tp,Hp)x(Hp,Ip)-sized matmuls
        transcendentals = Tp * Ip         # erf over the intermediate

        if resident:
            cost = pl.CostEstimate(
                flops=flops, transcendentals=transcendentals,
                bytes_accessed=io_bytes + weight_bytes + bias_bytes)
            out2 = pl.pallas_call(
                _ffn_resident_kernel,
                out_shape=jax.ShapeDtypeStruct((Tp, Hp), out_dt),
                grid_spec=pltpu.PrefetchScalarGridSpec(
                    num_scalar_prefetch=0,
                    grid=(grid_i,),
                    in_specs=[
                        pl.BlockSpec((tm, Hp), lambda i: (i, 0)),  # x token tile
                        _const_spec((Hp, Ip)),                     # W1 (resident)
                        _const_spec((1, Ip)),                      # b1 (resident)
                        _const_spec((Ip, Hp)),                     # W2 (resident)
                        _const_spec((1, Hp)),                      # b2 (resident)
                    ],
                    out_specs=pl.BlockSpec((tm, Hp), lambda i: (i, 0)),
                ),
                compiler_params=pltpu.CompilerParams(
                    dimension_semantics=("parallel",),
                    vmem_limit_bytes=vmem_limit,
                ),
                cost_estimate=cost,
            )(x2, w1p, b1p, w2p, b2p)
        else:
            cost = pl.CostEstimate(
                flops=flops, transcendentals=transcendentals,
                bytes_accessed=io_bytes + weight_bytes * grid_i + bias_bytes)
            out2 = pl.pallas_call(
                _ffn_streaming_kernel,
                out_shape=jax.ShapeDtypeStruct((Tp, Hp), out_dt),
                grid_spec=pltpu.PrefetchScalarGridSpec(
                    num_scalar_prefetch=0,
                    grid=(grid_i, Ip // ti),
                    in_specs=[
                        pl.BlockSpec((tm, Hp), lambda i, j: (i, 0)),  # x token tile
                        pl.BlockSpec((Hp, ti), lambda i, j: (0, j)),  # W1 chunk
                        pl.BlockSpec((1, ti), lambda i, j: (0, j)),   # b1 chunk
                        pl.BlockSpec((ti, Hp), lambda i, j: (j, 0)),  # W2 chunk
                        pl.BlockSpec((1, Hp), lambda i, j: (0, 0)),   # b2 (whole)
                    ],
                    out_specs=pl.BlockSpec((tm, Hp), lambda i, j: (i, 0)),
                    scratch_shapes=[pltpu.VMEM((tm, Hp), jnp.float32)],
                ),
                compiler_params=pltpu.CompilerParams(
                    dimension_semantics=("parallel", "arbitrary"),
                    vmem_limit_bytes=vmem_limit,
                ),
                cost_estimate=cost,
            )(x2, w1p, b1p, w2p, b2p)

        return out2[:T, :H].reshape(B, S, H)

    return jax.jit(apply)


def _reference(x, w1, b1, w2, b2):
    h = jnp.dot(x, w1) + b1
    h = _gelu_exact(h)
    return jnp.dot(h, w2) + b2


if __name__ == "__main__":
    batch, seq, hidden, intermediate = 2, 8, 32, 64

    key = jax.random.PRNGKey(0)
    k_x, k_w1, k_b1, k_w2, k_b2 = jax.random.split(key, 5)

    x = jax.random.normal(k_x, (batch, seq, hidden), dtype=jnp.float32)

    # nn.Linear(hidden, intermediate): weight (intermediate, hidden);
    # we store the transpose (hidden, intermediate) so the kernel does x @ W1.
    bound1 = 1.0 / math.sqrt(hidden)
    w1 = jax.random.uniform(k_w1, (hidden, intermediate),
                            minval=-bound1, maxval=bound1, dtype=jnp.float32)
    b1 = jax.random.uniform(k_b1, (intermediate,),
                            minval=-bound1, maxval=bound1, dtype=jnp.float32)

    bound2 = 1.0 / math.sqrt(intermediate)
    w2 = jax.random.uniform(k_w2, (intermediate, hidden),
                            minval=-bound2, maxval=bound2, dtype=jnp.float32)
    b2 = jax.random.uniform(k_b2, (hidden,),
                            minval=-bound2, maxval=bound2, dtype=jnp.float32)

    ref = _reference(x, w1, b1, w2, b2)

    # f32 path (matches the PyTorch module numerics). Weights padded/cast once.
    ffn_f32 = make_position_wise_ffn(w1, b1, w2, b2)
    out = jax.block_until_ready(ffn_f32(x))
    assert out.shape == (batch, seq, hidden)
    assert jnp.allclose(out, ref, atol=1e-5, rtol=1e-5), "f32 mismatch vs reference"

    # bf16-matmul path (recommended on v5e/v6e/v7x); loose smoke tolerance.
    ffn_bf16 = make_position_wise_ffn(w1, b1, w2, b2, compute_dtype=jnp.bfloat16)
    out_bf16 = jax.block_until_ready(ffn_bf16(x))
    assert out_bf16.shape == (batch, seq, hidden)
    assert jnp.allclose(out_bf16, ref, atol=1e-1, rtol=1e-1), "bf16 mismatch vs reference"

    print("KERNEL_OK")
</pallas_src>

<mosaic_0001>
module attributes {stable_mosaic.version = 11 : i64} {
  func.func @_ffn_resident_kernel(%arg0: i32, %arg1: memref<8x128xf32, #tpu.memory_space<vmem>>, %arg2: memref<128x128xf32, #tpu.memory_space<vmem>>, %arg3: memref<1x128xf32, #tpu.memory_space<vmem>>, %arg4: memref<128x128xf32, #tpu.memory_space<vmem>>, %arg5: memref<1x128xf32, #tpu.memory_space<vmem>>, %arg6: memref<8x128xf32, #tpu.memory_space<vmem>>) attributes {dimension_semantics = [#tpu.dimension_semantics<parallel>], iteration_bounds = array<i64: 2>, scalar_prefetch = 0 : i64, scratch_operands = 0 : i64, tpu.core_type = #tpu.core_type<tc>, window_params = [{transform_indices = @transform_0, window_bounds = array<i64: 8, 128>}, {pipeline_mode = #tpu.pipeline_mode<synchronous>, transform_indices = @transform_1, window_bounds = array<i64: 128, 128>}, {pipeline_mode = #tpu.pipeline_mode<synchronous>, transform_indices = @transform_2, window_bounds = array<i64: 1, 128>}, {pipeline_mode = #tpu.pipeline_mode<synchronous>, transform_indices = @transform_3, window_bounds = array<i64: 128, 128>}, {pipeline_mode = #tpu.pipeline_mode<synchronous>, transform_indices = @transform_4, window_bounds = array<i64: 1, 128>}, {transform_indices = @transform_5, window_bounds = array<i64: 8, 128>}]} {
    %c0 = arith.constant 0 : index
    %c0_0 = arith.constant 0 : index
    %0 = vector.load %arg1[%c0, %c0_0] : memref<8x128xf32, #tpu.memory_space<vmem>>, vector<8x128xf32>
    %c0_1 = arith.constant 0 : index
    %c0_2 = arith.constant 0 : index
    %1 = vector.load %arg2[%c0_1, %c0_2] : memref<128x128xf32, #tpu.memory_space<vmem>>, vector<128x128xf32>
    %cst = arith.constant dense<0.000000e+00> : vector<8x128xf32>
    %2 = tpu.matmul %0, %1, %cst {dimension_numbers = #tpu.dot_dimension_numbers<[1], [0], [0], [1], [0, 0, 1, 1], [], []>} : vector<8x128xf32>, vector<128x128xf32>, vector<8x128xf32> -> vector<8x128xf32>
    %c0_3 = arith.constant 0 : index
    %c0_4 = arith.constant 0 : index
    %3 = vector.load %arg3[%c0_3, %c0_4] : memref<1x128xf32, #tpu.memory_space<vmem>>, vector<1x128xf32>
    %4 = vector.broadcast %3 : vector<1x128xf32> to vector<8x128xf32>
    %5 = arith.addf %2, %4 : vector<8x128xf32>
    %cst_5 = arith.constant 5.000000e-01 : f32
    %6 = vector.broadcast %cst_5 : f32 to vector<8x128xf32>
    %7 = arith.mulf %5, %6 : vector<8x128xf32>
    %cst_6 = arith.constant 0.707106769 : f32
    %8 = vector.broadcast %cst_6 : f32 to vector<8x128xf32>
    %9 = arith.mulf %5, %8 : vector<8x128xf32>
    %10 = math.erf %9 : vector<8x128xf32>
    %cst_7 = arith.constant 1.000000e+00 : f32
    %11 = vector.broadcast %cst_7 : f32 to vector<8x128xf32>
    %12 = arith.addf %11, %10 : vector<8x128xf32>
    %13 = arith.mulf %7, %12 : vector<8x128xf32>
    %c0_8 = arith.constant 0 : index
    %c0_9 = arith.constant 0 : index
    %14 = vector.load %arg4[%c0_8, %c0_9] : memref<128x128xf32, #tpu.memory_space<vmem>>, vector<128x128xf32>
    %cst_10 = arith.constant dense<0.000000e+00> : vector<8x128xf32>
    %15 = tpu.matmul %13, %14, %cst_10 {dimension_numbers = #tpu.dot_dimension_numbers<[1], [0], [0], [1], [0, 0, 1, 1], [], []>} : vector<8x128xf32>, vector<128x128xf32>, vector<8x128xf32> -> vector<8x128xf32>
    %c0_11 = arith.constant 0 : index
    %c0_12 = arith.constant 0 : index
    %16 = vector.load %arg5[%c0_11, %c0_12] : memref<1x128xf32, #tpu.memory_space<vmem>>, vector<1x128xf32>
    %17 = vector.broadcast %16 : vector<1x128xf32> to vector<8x128xf32>
    %18 = arith.addf %15, %17 : vector<8x128xf32>
    %c0_13 = arith.constant 0 : index
    %c0_14 = arith.constant 0 : index
    %19 = vector.load %arg6[%c0_13, %c0_14] : memref<8x128xf32, #tpu.memory_space<vmem>>, vector<8x128xf32>
    tpu.vector_store %arg6[%c0_13, %c0_14], %18 {strides = array<i32>} : memref<8x128xf32, #tpu.memory_space<vmem>>, vector<8x128xf32>,
    return
  }
  func.func @transform_0(%arg0: i32) -> (i32, i32) {
    %c0_i32 = arith.constant 0 : i32
    %c0_i32_0 = arith.constant 0 : i32
    return %arg0, %c0_i32 : i32, i32
  }
  func.func @transform_1(%arg0: i32) -> (i32, i32) {
    %c0_i32 = arith.constant 0 : i32
    %c0_i32_0 = arith.constant 0 : i32
    %c0_i32_1 = arith.constant 0 : i32
    return %c0_i32, %c0_i32_0 : i32, i32
  }
  func.func @transform_2(%arg0: i32) -> (i32, i32) {
    %c0_i32 = arith.constant 0 : i32
    %c0_i32_0 = arith.constant 0 : i32
    %c0_i32_1 = arith.constant 0 : i32
    return %c0_i32, %c0_i32_0 : i32, i32
  }
  func.func @transform_3(%arg0: i32) -> (i32, i32) {
    %c0_i32 = arith.constant 0 : i32
    %c0_i32_0 = arith.constant 0 : i32
    %c0_i32_1 = arith.constant 0 : i32
    return %c0_i32, %c0_i32_0 : i32, i32
  }
  func.func @transform_4(%arg0: i32) -> (i32, i32) {
    %c0_i32 = arith.constant 0 : i32
    %c0_i32_0 = arith.constant 0 : i32
    %c0_i32_1 = arith.constant 0 : i32
    return %c0_i32, %c0_i32_0 : i32, i32
  }
  func.func @transform_5(%arg0: i32) -> (i32, i32) {
    %c0_i32 = arith.constant 0 : i32
    %c0_i32_0 = arith.constant 0 : i32
    return %arg0, %c0_i32 : i32, i32
  }
}

</mosaic_0001>

<bundles_post_ra>
// kernel: apply.1
= control target key start
LH: loop header
LB: loop body
LE: loop exit
PB: predicated region body
PF: predicated region fallthrough
CT: control target
= control target key end

     0   :  { %10 = vsyncpa [#allocation3], 0  ;;  %s673_s0 = inlined_call_operand.vmem [shape: f32[16,128], index: 0, kind: input, shape index: {}]   ;;  %s674_s1 = inlined_call_operand.hbm [shape: f32[128,128], index: 1, kind: input, shape index: {}]   ;;  %s675_s2 = inlined_call_operand.vmem [shape: f32[1,128], index: 2, kind: input, shape index: {}]   ;;  %s676_s3 = inlined_call_operand.hbm [shape: f32[128,128], index: 3, kind: input, shape index: {}]   ;;  %s677_s4 = inlined_call_operand.vmem [shape: f32[1,128], index: 4, kind: input, shape index: {}]   ;;  %s678_s5 = inlined_call_operand.vmem [shape: f32[16,128], index: 5, kind: output, shape index: {}]  }
   0x1   :  { %11 = vsyncpa [#allocation5], 0  ;;  %s614_s18 = smov 0  }
   0x2 LB: > { %s169_s21 = sshll.u32 %s674_s1, 4  ;;  %s623_s22 = sadd.s32 4294967295, %s578_s18   ;;  %s578_s18 = sphi %s614_s18, %s17_s18   ;;  %s170_s21 = int_to_ptr.hbm [resolvable:$true] %s169_s21 }
   0x3   : > { %p457_p0 = scmp.ge.s32.totalorder %s578_s18, 1  ;;  %p158_p1 = scmp.lt.s32.totalorder %s578_s18, 3 }
   0x4   : > { %p484_p2 = scmp.eq.s32.totalorder %s623_s22, 0  ;;  %s580_s24 = smov [#allocation2]  }
   0x5   : > { %p628_p3 = pnand %p457_p0, %p158_p1  ;;  %s171_s25 = sshll.u32 %s580_s24, 4  ;;  %s172_s25 = int_to_ptr.vmem [resolvable:$true] %s171_s25 }
   0x6   : > { %s186_s28 = sshll.u32 %s676_s3, 4  ;;  %s581_s29 = smov [#allocation4]   ;;  %s187_s28 = int_to_ptr.hbm [resolvable:$true] %s186_s28 }
   0x7   : > { %p477_p4 = pneg %p628_p3  ;;  %s188_s30 = sshll.u32 %s581_s29, 4  ;;  %s189_s30 = int_to_ptr.vmem [resolvable:$true] %s188_s30 }
   0x8   : > { %s582_s6 = smov 128   ;;  %s583_s7 = smov 8  }
   0x9   : > { %p478_p5 = pnand %p484_p2, %p477_p4  ;;  %214 = sbr.rel (%p628_p3) target bundleno = 357 (0x165), region = 40 }
   0xb   : > { %480 = dma.hbm_to_vmem [thread:$0]  (!%p478_p5), %s170_s21, 2048, %s172_s25, [#allocation3], %s582_s6, %s582_s6, %s583_s7  }
   0xc   : > { %483 = dma.hbm_to_vmem [thread:$0]  (!%p478_p5), %s187_s28, 2048, %s189_s30, [#allocation5], %s582_s6, %s582_s6, %s583_s7  }
   0xe   : > { %569 = dma.done.wait (%p484_p2), [#allocation3], 2048  }
   0xf   : > { %571 = vsyncadd (%p484_p2), [#allocation3], 4294965248 }
  0x10   : > { %573 = dma.done.wait (%p484_p2), [#allocation5], 2048  }
  0x11   : > { %575 = vsyncadd (%p484_p2), [#allocation5], 4294965248  ;;  %v270_v0 = vld [vmem:[#allocation2 + $0x78] sm:$0xff]  ;;  %v269_v1 = vld [vmem:[#allocation2 + $0x70] sm:$0xff]  ;;  %p246_p6 = scmp.lt.s32.totalorder %s623_s22, 1 }
  0x12   : > { %275 = vmatpush.msra.mxu0 %v270_v0  ;;  %v268_v2 = vld [vmem:[#allocation2 + $0x68] sm:$0xff]  ;;  %v267_v3 = vld [vmem:[#allocation2 + $0x60] sm:$0xff]  ;;  %v266_v4 = vld [vmem:[#allocation2 + $0x58] sm:$0xff] }
  0x13   : > { %v265_v5 = vld [vmem:[#allocation2 + $0x50] sm:$0xff]  ;;  %v264_v6 = vld [vmem:[#allocation2 + $0x48] sm:$0xff]  ;;  %v263_v7 = vld [vmem:[#allocation2 + $0x40] sm:$0xff]  ;;  %s681_s22 = smov (!%p246_p6, %s623_s22), 1 }
  0x14   : > { %276 = vmatpush.msra.mxu0 %v269_v1  ;;  %v262_v8 = vld [vmem:[#allocation2 + $0x38] sm:$0xff]  ;;  %v261_v9 = vld [vmem:[#allocation2 + $0x30] sm:$0xff]  ;;  %v260_v10 = vld [vmem:[#allocation2 + $0x28] sm:$0xff]  ;;  %s464_s8 = sshll.u32 %s681_s22, 3 }
  0x15   : > { %v259_v11 = vld [vmem:[#allocation2 + $0x20] sm:$0xff]  ;;  %v258_v12 = vld [vmem:[#allocation2 + $0x18] sm:$0xff]  ;;  %v257_v13 = vld [vmem:[#allocation2 + $0x10] sm:$0xff]  ;;  %s249_s11 = scalar_lea.vmem %s673_s0, %s464_s8  ;;  %s253_s19 = scalar_lea.vmem %s678_s5, %s464_s8 }
  0x16   : > { %277 = vmatpush.msra.mxu0 %v268_v2  ;;  %v256_v14 = vld [vmem:[#allocation2 + $0x8] sm:$0xff]  ;;  %v255_v15 = vld [vmem:[#allocation2] sm:$0xff]  ;;  %v354_v17 = vld [vmem:[#allocation4 + $0x78] sm:$0xff] }
  0x17   : > { %v254_v16 = vld [vmem:[%s249_s11] sm:$0xff]  ;;  %359 = vmatpush.msra.mxu1 %v354_v17  ;;  %v353_v18 = vld [vmem:[#allocation4 + $0x70] sm:$0xff]  ;;  %v352_v19 = vld [vmem:[#allocation4 + $0x68] sm:$0xff] }
  0x18   : > { %278 = vmatpush.msra.mxu0 %v267_v3  ;;  %v351_v20 = vld [vmem:[#allocation4 + $0x60] sm:$0xff]  ;;  %v350_v22 = vld [vmem:[#allocation4 + $0x58] sm:$0xff]  ;;  %v349_v23 = vld [vmem:[#allocation4 + $0x50] sm:$0xff] }
  0x19   : > { %360 = vmatpush.msra.mxu1 %v353_v18  ;;  %v500_v21 = vld [vmem:[%s675_s2] ss:$0 sm:$0xff]  ;;  %v348_v25 = vld [vmem:[#allocation4 + $0x48] sm:$0xff]  ;;  %v346_v29 = vld [vmem:[#allocation4 + $0x38] sm:$0xff] }
  0x1a   : > { %279 = vmatpush.msra.mxu0 %v266_v4  ;;  %v347_v27 = vld [vmem:[#allocation4 + $0x40] sm:$0xff]  ;;  %v345_v31 = vld [vmem:[#allocation4 + $0x30] sm:$0xff]  ;;  %v344_v33 = vld [vmem:[#allocation4 + $0x28] sm:$0xff] }
  0x1b   : > { %361 = vmatpush.msra.mxu1 %v352_v19  ;;  %v343_v36 = vld [vmem:[#allocation4 + $0x20] sm:$0xff]  ;;  %v342_v39 = vld [vmem:[#allocation4 + $0x18] sm:$0xff]  ;;  %v341_v42 = vld [vmem:[#allocation4 + $0x10] sm:$0xff] }
  0x1c   : > { %280 = vmatpush.msra.mxu0 %v265_v5  ;;  %v340_v45 = vld [vmem:[#allocation4 + $0x8] sm:$0xff]  ;;  %v339_v47 = vld [vmem:[#allocation4] sm:$0xff] }
  0x1d   : > { %362 = vmatpush.msra.mxu1 %v351_v20 }
  0x1e   : > { %281 = vmatpush.msra.mxu0 %v264_v6 }
  0x1f   : > { %363 = vmatpush.msra.mxu1 %v350_v22 }
  0x20   : > { %282 = vmatpush.msra.mxu0 %v263_v7 }
  0x21   : > { %364 = vmatpush.msra.mxu1 %v349_v23 }
  0x22   : > { %283 = vmatpush.msra.mxu0 %v262_v8 }
  0x23   : > { %365 = vmatpush.msra.mxu1 %v348_v25 }
  0x24   : > { %284 = vmatpush.msra.mxu0 %v261_v9 }
  0x25   : > { %366 = vmatpush.msra.mxu1 %v347_v27 }
  0x26   : > { %285 = vmatpush.msra.mxu0 %v260_v10 }
  0x27   : > { %367 = vmatpush.msra.mxu1 %v346_v29 }
  0x28   : > { %286 = vmatpush.msra.mxu0 %v259_v11  ;;  %v501_v11 = vld [vmem:[%s677_s4] ss:$0 sm:$0xff] }
  0x29   : > { %368 = vmatpush.msra.mxu1 %v345_v31 }
  0x2a   : > { %287 = vmatpush.msra.mxu0 %v258_v12 }
  0x2b   : > { %369 = vmatpush.msra.mxu1 %v344_v33 }
  0x2c   : > { %288 = vmatpush.msra.mxu0 %v257_v13 }
  0x2d   : > { %370 = vmatpush.msra.mxu1 %v343_v36 }
  0x2e   : > { %289 = vmatpush.msra.mxu0 %v256_v14 }
  0x2f   : > { %371 = vmatpush.msra.mxu1 %v342_v39 }
  0x30   : > { %290 = vmatpush.msra.mxu0 %v255_v15 }
  0x31   : > { %291 = vmatmul.f32.vlgmr.msra.gmra.mxu0 %v254_v16  ;;  %372 = vmatpush.msra.mxu1 %v341_v42 }
  0x33   : > { %373 = vmatpush.msra.mxu1 %v340_v45 }
  0x35   : > { %374 = vmatpush.msra.mxu1 %v339_v47 }
  0xae   : > { %v292_v24 = vpop.f32.mrf.mxu0 }
  0xaf   : > { %v293_v26 = vadd.f32 %v500_v21, %v292_v24 }
  0xb1   : > { %v296_v28 = vmul.f32 0.70710677, %v293_v26  ;;  %v295_v8 = vmul.f32 0.5, %v293_v26 }
  0xb3   : > { %v297_v30 = vmul.f32 %v296_v28, %v296_v28 }
  0xb5   : > { %v298_v32 = vmin.f32 %v297_v30, 16.0 }
  0xb7   : > { %v299_v34 = vmul.f32 2.1237322e-06, %v298_v32  ;;  %v310_v35 = vmul.f32 3.8918573e-05, %v298_v32 }
  0xb9   : > { %v300_v37 = vadd.f32 0.00028619796, %v299_v34  ;;  %v311_v38 = vadd.f32 0.001143296, %v310_v35 }
  0xbb   : > { %v301_v40 = vmul.f32 %v300_v37, %v298_v32  ;;  %v312_v41 = vmul.f32 %v311_v38, %v298_v32 }
  0xbd   : > { %v313_v43 = vadd.f32 0.014752088, %v312_v41  ;;  %v302_v44 = vadd.f32 0.0036580483, %v301_v40 }
  0xbf   : > { %v314_v46 = vmul.f32 %v313_v43, %v298_v32  ;;  %v303_v49 = vmul.f32 %v302_v44, %v298_v32 }
  0xc1   : > { %v315_v48 = vadd.f32 0.112945676, %v314_v46  ;;  %v304_v52 = vadd.f32 0.05243302, %v303_v49 }
  0xc3   : > { %v316_v50 = vmul.f32 %v315_v48, %v298_v32  ;;  %v305_v55 = vmul.f32 %v304_v52, %v298_v32 }
  0xc5   : > { %v317_v51 = vadd.f32 0.4994258, %v316_v50  ;;  %v306_v56 = vadd.f32 0.18741608, %v305_v55 }
  0xc7   : > { %v318_v53 = vmul.f32 %v317_v51, %v298_v32  ;;  %v307_v58 = vmul.f32 %v306_v56, %v298_v32 }
  0xc9   : > { %v319_v54 = vadd.f32 1.0, %v318_v53  ;;  %v308_v62 = vadd.f32 1.1283791, %v307_v58 }
  0xcb   : > { %502 = vrcp.f32 %v319_v54  ;;  %v331_v61 = vand.u32 2147483648, %v319_v54  ;;  %v329_v0 = vand.u32 2147483647, %v319_v54  ;;  %vm325_vm1 = vweird.f32 %v319_v54 }
  0xcc   : > { %v309_v3 = vmul.f32 %v308_v62, %v296_v28 }
  0xcd   : > { %v332_v2 = vor.u32 1.1754944e-38, %v331_v61  ;;  %vm330_vm3 = vcmp.eq.f32.partialorder %v329_v0, 8.507059e+37 }
  0xd1   : > { %v503_v57 = vpop.eup %502 }
  0xd2   : > { %v321_v59 = vmul.f32 %v503_v57, %v319_v54  ;;  %vm326_vm0 = vweird.f32 %v503_v57 }
  0xd3   : > { %vm327_vm2 = vmor %vm325_vm1, %vm326_vm0 }
  0xd4   : > { %v322_v60 = vsub.f32 1.0, %v321_v59 }
  0xd6   : > { %v323_v63 = vmul.f32 %v503_v57, %v322_v60 }
  0xd8   : > { %v324_v1 = vadd.f32 %v503_v57, %v323_v63 }
  0xda   : > { %v328_v4 = vsel %vm327_vm2, %v503_v57, %v324_v1 }
  0xdb   : > { %v333_v5 = vsel %vm330_vm3, %v332_v2, %v328_v4 }
  0xdc   : > { %v334_v6 = vmul.f32 %v333_v5, %v309_v3 }
  0xde   : > { %v466_v7 = vclamps-f32 %v334_v6, 1.0 }
  0xe0   : > { %v337_v9 = vadd.f32 1.0, %v466_v7 }
  0xe2   : > { %v338_v10 = vmul.f32 %v337_v9, %v295_v8 }
  0xe4   : > { %375 = vmatmul.f32.vlgmr.msra.gmra.mxu1 %v338_v10 }
 0x161   : > { %v376_v12 = vpop.f32.mrf.mxu1 }
 0x162   : > { %v377_v13 = vadd.f32 %v501_v11, %v376_v12 }
 0x164   : > { %379 = vst [vmem:[%s253_s19] sm:$0xff] %v377_v13 }
 0x165 PF: > { %s17_s18 = sadd.s32 1, %s578_s18  }
 0x166   : > { %p14_p7 = scmp.ge.s32.totalorder %s17_s18, 4  }
 0x168   :  { %16 = sbr.rel (!%p14_p7) target bundleno = 2 (0x2), region = 79 }
 0x16d   :  { %399 = vsyncpa [#allocation3], 1 }
 0x16e   :  { %401 = vsyncpa [#allocation3 + $0x1], 1 }
 0x16f   :  { %402 = vsyncpa [#allocation5], 1 }

</bundles_post_ra>
